<compile_context>
chip_gen: v7x
topology: tpu7x:2x2x1
jax: 0.10.0
libtpu: 0.0.40
codegen_flags: <defaults>
</compile_context>

<pallas_src>
import functools

import jax
import jax.numpy as jnp
from jax.experimental import pallas as pl
from jax.experimental.pallas import tpu as pltpu

LANE = 128
MAX_TILE_ROWS = 2048  # 2048 x 128 f32 = 1 MiB per input per grid step


def _dice_partials_kernel(x_ref, t_ref, inter_ref, denom_ref, *,
                          tile_rows, full_rows, rem, needs_mask):
    x = x_ref[...].astype(jnp.float32)
    t = t_ref[...].astype(jnp.float32)
    s = jax.nn.sigmoid(x)

    inter = s * t  # intersection terms
    denom = s + t  # fused denominator terms: sum(s) + sum(t) == sum(s + t)

    if needs_mask:
        # Mask the ragged tail (true element count n = full_rows*128 + rem)
        # and any Pallas partial-edge-block garbage.  A few VPU ops, hidden
        # under the DMA of a memory-bound kernel.
        i = pl.program_id(0)
        row = i * tile_rows + jax.lax.broadcasted_iota(
            jnp.int32, (tile_rows, LANE), 0)
        col = jax.lax.broadcasted_iota(jnp.int32, (tile_rows, LANE), 1)
        valid = (row < full_rows) | ((row == full_rows) & (col < rem))
        inter = jnp.where(valid, inter, 0.0)
        denom = jnp.where(valid, denom, 0.0)

    # VPU-only partial reduce: collapse the tile to one (8, 128) slab of
    # partial sums.  (tile_rows, 128) -> (tile_rows//8, 8, 128) is a
    # layout-preserving reshape; summing axis 0 is pure vector adds.
    # The single cross-lane reduce happens once, in the wrapper epilogue.
    inter_ref[0, :, :] = jnp.sum(inter.reshape(-1, 8, LANE), axis=0)
    denom_ref[0, :, :] = jnp.sum(denom.reshape(-1, 8, LANE), axis=0)


def dice_loss(inputs, targets, smooth=1.0):
    """Pallas equivalent of DiceLoss.forward(inputs, targets, smooth)."""
    n = inputs.size
    assert targets.size == n

    # Stream native dtypes (bf16/f32/int); only bool needs a wrapper cast.
    if inputs.dtype == jnp.bool_:
        inputs = inputs.astype(jnp.float32)
    if targets.dtype == jnp.bool_:
        targets = targets.astype(jnp.float32)

    x = jnp.ravel(inputs)
    t = jnp.ravel(targets)

    rem = n % LANE
    pad = (LANE - rem) % LANE
    if pad:
        # TODO(synk): n % 128 != 0 costs one small pad copy; padded elements
        # are masked in-kernel so the pad value is irrelevant.
        x = jnp.pad(x, (0, pad))
        t = jnp.pad(t, (0, pad))
    rows = (n + pad) // LANE
    x = x.reshape(rows, LANE)
    t = t.reshape(rows, LANE)

    tile_rows = min(MAX_TILE_ROWS, ((rows + 7) // 8) * 8)
    nb = pl.cdiv(rows, tile_rows)
    full_rows = n // LANE
    needs_mask = (rem != 0) or (rows % tile_rows != 0)

    kernel = functools.partial(
        _dice_partials_kernel,
        tile_rows=tile_rows, full_rows=full_rows, rem=rem,
        needs_mask=needs_mask)

    inter_parts, denom_parts = pl.pallas_call(
        kernel,
        out_shape=(jax.ShapeDtypeStruct((nb, 8, LANE), jnp.float32),
                   jax.ShapeDtypeStruct((nb, 8, LANE), jnp.float32)),
        grid=(nb,),
        in_specs=[
            pl.BlockSpec((tile_rows, LANE), lambda i: (i, 0)),
            pl.BlockSpec((tile_rows, LANE), lambda i: (i, 0)),
        ],
        out_specs=(
            pl.BlockSpec((1, 8, LANE), lambda i: (i, 0, 0)),
            pl.BlockSpec((1, 8, LANE), lambda i: (i, 0, 0)),
        ),
        compiler_params=pltpu.CompilerParams(
            dimension_semantics=("parallel",),   # lets v7x use both TCs
            vmem_limit_bytes=32 * 1024 * 1024,
        ),
    )(x, t)

    # Tiny epilogue in plain JAX: cross-block + cross-lane reduce and the
    # final dice formula.
    inter = jnp.sum(inter_parts)
    denom = jnp.sum(denom_parts)
    smooth = jnp.float32(smooth)
    dice = (2.0 * inter + smooth) / (denom + smooth)
    return 1.0 - dice


def dice_loss_ref(inputs, targets, smooth=1.0):
    s = jax.nn.sigmoid(inputs.astype(jnp.float32)).reshape(-1)
    t = targets.astype(jnp.float32).reshape(-1)
    inter = jnp.sum(s * t)
    dice = (2.0 * inter + smooth) / (jnp.sum(s) + jnp.sum(t) + smooth)
    return 1.0 - dice


if __name__ == "__main__":
    key = jax.random.PRNGKey(0)
    k1, k2, k3, k4 = jax.random.split(key, 4)

    # Segmentation-style use: logits + binary masks.
    inputs = jax.random.normal(k1, (2, 4, 16, 16), dtype=jnp.float32)
    targets = (jax.random.uniform(k2, (2, 4, 16, 16)) > 0.5).astype(jnp.float32)

    loss = dice_loss(inputs, targets, smooth=1.0)
    loss = jax.block_until_ready(loss)
    ref = dice_loss_ref(inputs, targets, smooth=1.0)
    assert jnp.allclose(loss, ref, rtol=1e-5, atol=1e-5), (loss, ref)

    # Ragged size (n % 128 != 0) exercises the in-kernel tail mask.
    inputs2 = jax.random.normal(k3, (3, 5, 17, 19), dtype=jnp.float32)
    targets2 = (jax.random.uniform(k4, (3, 5, 17, 19)) > 0.5).astype(jnp.float32)
    loss2 = jax.block_until_ready(dice_loss(inputs2, targets2, smooth=1.0))
    ref2 = dice_loss_ref(inputs2, targets2, smooth=1.0)
    assert jnp.allclose(loss2, ref2, rtol=1e-5, atol=1e-5), (loss2, ref2)

    # bf16 logits stream in native dtype (cast to f32 inside the kernel).
    inputs3 = inputs.astype(jnp.bfloat16)
    loss3 = jax.block_until_ready(dice_loss(inputs3, targets, smooth=1.0))
    ref3 = dice_loss_ref(inputs3, targets, smooth=1.0)
    assert jnp.allclose(loss3, ref3, rtol=1e-4, atol=1e-4), (loss3, ref3)

    print("KERNEL_OK")
</pallas_src>

<mosaic_0001>
module attributes {stable_mosaic.version = 11 : i64} {
  func.func @_dice_partials_kernel(%arg0: i32, %arg1: memref<16x128xf32, #tpu.memory_space<vmem>>, %arg2: memref<16x128xf32, #tpu.memory_space<vmem>>, %arg3: memref<1x8x128xf32, #tpu.memory_space<vmem>>, %arg4: memref<1x8x128xf32, #tpu.memory_space<vmem>>) attributes {dimension_semantics = [#tpu.dimension_semantics<parallel>], iteration_bounds = array<i64: 1>, scalar_prefetch = 0 : i64, scratch_operands = 0 : i64, tpu.core_type = #tpu.core_type<tc>, window_params = [{transform_indices = @transform_0, window_bounds = array<i64: 16, 128>}, {transform_indices = @transform_1, window_bounds = array<i64: 16, 128>}, {transform_indices = @transform_2, window_bounds = array<i64: 1, 8, 128>}, {transform_indices = @transform_3, window_bounds = array<i64: 1, 8, 128>}]} {
    %c0 = arith.constant 0 : index
    %c0_0 = arith.constant 0 : index
    %0 = vector.load %arg1[%c0, %c0_0] : memref<16x128xf32, #tpu.memory_space<vmem>>, vector<16x128xf32>
    %c0_1 = arith.constant 0 : index
    %c0_2 = arith.constant 0 : index
    %1 = vector.load %arg2[%c0_1, %c0_2] : memref<16x128xf32, #tpu.memory_space<vmem>>, vector<16x128xf32>
    %2 = arith.negf %0 : vector<16x128xf32>
    %3 = math.exp %2 : vector<16x128xf32>
    %cst = arith.constant 1.000000e+00 : f32
    %4 = vector.broadcast %cst : f32 to vector<16x128xf32>
    %5 = arith.addf %4, %3 : vector<16x128xf32>
    %6 = arith.divf %4, %5 : vector<16x128xf32>
    %7 = arith.mulf %6, %1 : vector<16x128xf32>
    %8 = arith.addf %6, %1 : vector<16x128xf32>
    %9 = vector.shape_cast %7 : vector<16x128xf32> to vector<2x8x128xf32>
    %cst_3 = arith.constant dense<0.000000e+00> : vector<8x128xf32>
    %10 = vector.multi_reduction <add>, %9, %cst_3 [0] : vector<2x8x128xf32> to vector<8x128xf32>
    %c0_4 = arith.constant 0 : index
    %c0_5 = arith.constant 0 : index
    %c0_6 = arith.constant 0 : index
    %11 = vector.load %arg3[%c0_4, %c0_5, %c0_6] : memref<1x8x128xf32, #tpu.memory_space<vmem>>, vector<1x8x128xf32>
    %12 = vector.shape_cast %11 : vector<1x8x128xf32> to vector<8x128xf32>
    %13 = vector.shape_cast %10 : vector<8x128xf32> to vector<1x8x128xf32>
    tpu.vector_store %arg3[%c0_4, %c0_5, %c0_6], %13 {strides = array<i32>} : memref<1x8x128xf32, #tpu.memory_space<vmem>>, vector<1x8x128xf32>,
    %14 = vector.shape_cast %8 : vector<16x128xf32> to vector<2x8x128xf32>
    %cst_7 = arith.constant dense<0.000000e+00> : vector<8x128xf32>
    %15 = vector.multi_reduction <add>, %14, %cst_7 [0] : vector<2x8x128xf32> to vector<8x128xf32>
    %c0_8 = arith.constant 0 : index
    %c0_9 = arith.constant 0 : index
    %c0_10 = arith.constant 0 : index
    %16 = vector.load %arg4[%c0_8, %c0_9, %c0_10] : memref<1x8x128xf32, #tpu.memory_space<vmem>>, vector<1x8x128xf32>
    %17 = vector.shape_cast %16 : vector<1x8x128xf32> to vector<8x128xf32>
    %18 = vector.shape_cast %15 : vector<8x128xf32> to vector<1x8x128xf32>
    tpu.vector_store %arg4[%c0_8, %c0_9, %c0_10], %18 {strides = array<i32>} : memref<1x8x128xf32, #tpu.memory_space<vmem>>, vector<1x8x128xf32>,
    return
  }
  func.func @transform_0(%arg0: i32) -> (i32, i32) {
    %c0_i32 = arith.constant 0 : i32
    %c0_i32_0 = arith.constant 0 : i32
    return %arg0, %c0_i32 : i32, i32
  }
  func.func @transform_1(%arg0: i32) -> (i32, i32) {
    %c0_i32 = arith.constant 0 : i32
    %c0_i32_0 = arith.constant 0 : i32
    return %arg0, %c0_i32 : i32, i32
  }
  func.func @transform_2(%arg0: i32) -> (i32, i32, i32) {
    %c0_i32 = arith.constant 0 : i32
    %c0_i32_0 = arith.constant 0 : i32
    %c0_i32_1 = arith.constant 0 : i32
    return %arg0, %c0_i32, %c0_i32_0 : i32, i32, i32
  }
  func.func @transform_3(%arg0: i32) -> (i32, i32, i32) {
    %c0_i32 = arith.constant 0 : i32
    %c0_i32_0 = arith.constant 0 : i32
    %c0_i32_1 = arith.constant 0 : i32
    return %arg0, %c0_i32, %c0_i32_0 : i32, i32, i32
  }
}

</mosaic_0001>

<bundles_post_ra>
// kernel: tpu_custom_call.1
= control target key start
LH: loop header
LB: loop body
LE: loop exit
PB: predicated region body
PF: predicated region fallthrough
CT: control target
= control target key end

     0   :  { %9 = vsyncpa [#allocation3], 0  ;;  %s283_s0 = inlined_call_operand.hbm [shape: f32[16,128], index: 0, kind: input, shape index: {}]   ;;  %s284_s1 = inlined_call_operand.hbm [shape: f32[16,128], index: 1, kind: input, shape index: {}]   ;;  %s285_s2 = inlined_call_operand.hbm [shape: f32[1,8,128], index: 2, kind: output, shape index: {0}]   ;;  %s286_s3 = inlined_call_operand.hbm [shape: f32[1,8,128], index: 3, kind: output, shape index: {1}]  }
   0x1   :  { %10 = vsyncpa [#allocation6], 0 }
   0x2   :  { %11 = vsyncpa [#allocation4], 0 }
   0x3   :  { %12 = vsyncpa [#allocation9], 0  ;;  %s209_s12 = smov [#allocation2]   ;;  %s113_s16 = scalar_lea.hbm %s283_s0, 256 }
   0x4   :  { %s18_s13 = sshll.u32 %s209_s12, 4  ;;  %p114_p0 = scmp.ne.s32.totalorder %s283_s0, %s113_s16  ;;  %s19_s13 = int_to_ptr.vmem [resolvable:$true] %s18_s13 }
   0x5   :  { %p117_p1 = scmp.lt.u32.totalorder %s113_s16, %s283_s0 }
   0x7   :  { %p119_p2 = pnand %p117_p1, %p114_p0 }
   0x9   :  { %122 = shalt.err (!%p119_p2)
}
   0xa   :  { %s123_s21 = scalar_lea.vmem %s19_s13, 256  ;;  %p128_p4 = scmp.lt.s32.totalorder %s19_s13, %s19_s13 }
   0xb   :  { %p124_p3 = scmp.ne.s32.totalorder %s19_s13, %s123_s21  ;;  %p129_p5 = scmp.lt.s32.totalorder %s123_s21, %s123_s21 }
   0xd   :  { %p130_p6 = por %p129_p5, %p128_p4 }
   0xf   :  { %p131_p7 = pnand %p130_p6, %p124_p3 }
  0x11   :  { %134 = shalt.err (!%p131_p7)
}
  0x12   :  { %s210_s22 = smov 128   ;;  %s211_s23 = smov 8  }
  0x13   :  { %24 = dma.hbm_to_vmem [thread:$0]  %s283_s0, 256, %s19_s13, [#allocation3], %s210_s22, %s210_s22, %s211_s23  }
  0x14   :  { %s212_s26 = smov [#allocation5]   ;;  %s135_s30 = scalar_lea.hbm %s284_s1, 256 }
  0x15   :  { %s30_s27 = sshll.u32 %s212_s26, 4  ;;  %p136_p8 = scmp.ne.s32.totalorder %s284_s1, %s135_s30  ;;  %s31_s27 = int_to_ptr.vmem [resolvable:$true] %s30_s27 }
  0x16   :  { %p139_p9 = scmp.lt.u32.totalorder %s135_s30, %s284_s1 }
  0x18   :  { %p141_p10 = pnand %p139_p9, %p136_p8 }
  0x1a   :  { %144 = shalt.err (!%p141_p10)
}
  0x1b   :  { %s145_s8 = scalar_lea.vmem %s31_s27, 256  ;;  %p150_p12 = scmp.lt.s32.totalorder %s31_s27, %s31_s27 }
  0x1c   :  { %p146_p11 = scmp.ne.s32.totalorder %s31_s27, %s145_s8  ;;  %p151_p13 = scmp.lt.s32.totalorder %s145_s8, %s145_s8 }
  0x1e   :  { %p152_p0 = por %p151_p13, %p150_p12 }
  0x20   :  { %p153_p1 = pnand %p152_p0, %p146_p11 }
  0x22   :  { %156 = shalt.err (!%p153_p1)
}
  0x23   :  { %36 = dma.hbm_to_vmem [thread:$0]  %s284_s1, 256, %s31_s27, [#allocation6], %s210_s22, %s210_s22, %s211_s23  }
  0x24   :  { %201 = dma.done.wait [#allocation3], 256  }
  0x25   :  { %202 = vsyncadd [#allocation3], 4294967040 }
  0x26   :  { %203 = dma.done.wait [#allocation6], 256  }
  0x27   :  { %204 = vsyncadd [#allocation6], 4294967040  ;;  %v43_v0 = vld [vmem:[#allocation2] sm:$0xff]  ;;  %v44_v1 = vld [vmem:[#allocation2 + $0x8] sm:$0xff]  ;;  %s213_s1 = smov [#allocation7]   ;;  %s214_s11 = smov [#allocation8]  }
  0x28   :  { %v97_v2 = vmul.f32 -1.442695, %v43_v0  ;;  %v98_v3 = vmul.f32 -1.442695, %v44_v1  ;;  %v45_v8 = vld [vmem:[#allocation5] sm:$0xff]  ;;  %v46_v9 = vld [vmem:[#allocation5 + $0x8] sm:$0xff] }
  0x29   :  { %s73_s10 = sshll.u32 %s213_s1, 4  ;;  %s83_s12 = sshll.u32 %s214_s11, 4  ;;  %s74_s10 = int_to_ptr.vmem [resolvable:$true] %s73_s10  ;;  %s84_s12 = int_to_ptr.vmem [resolvable:$true] %s83_s12 }
  0x2a   :  { %105 = vpow2.f32 %v97_v2  ;;  %s157_s13 = scalar_lea.vmem %s74_s10, 128  ;;  %p162_p3 = scmp.lt.s32.totalorder %s74_s10, %s74_s10 }
  0x2b   :  { %107 = vpow2.f32 %v98_v3  ;;  %p158_p2 = scmp.ne.s32.totalorder %s74_s10, %s157_s13  ;;  %p163_p4 = scmp.lt.s32.totalorder %s157_s13, %s157_s13 }
  0x2d   :  { %p164_p5 = por %p163_p4, %p162_p3 }
  0x2f   :  { %p165_p6 = pnand %p164_p5, %p158_p2 }
  0x34   :  { %v106_v4 = vpop.eup %105 }
  0x35   :  { %v108_v5 = vpop.eup %107  ;;  %v53_v6 = vadd.f32 1.0, %v106_v4 }
  0x36   :  { %v54_v7 = vadd.f32 1.0, %v108_v5 }
  0x37   :  { %109 = vrcp.f32 %v53_v6 }
  0x38   :  { %111 = vrcp.f32 %v54_v7 }
  0x41   :  { %v110_v10 = vpop.eup %109 }
  0x42   :  { %v112_v11 = vpop.eup %111  ;;  %v59_v12 = vmul.f32 %v110_v10, %v45_v8  ;;  %v61_v13 = vadd.f32 %v110_v10, %v45_v8 }
  0x43   :  { %v60_v14 = vmul.f32 %v112_v11, %v46_v9  ;;  %v62_v15 = vadd.f32 %v112_v11, %v46_v9 }
  0x45   :  { %v63_v16 = vadd.f32 %v60_v14, %v59_v12  ;;  %v65_v17 = vadd.f32 %v62_v15, %v61_v13 }
  0x47   :  { %64 = vst [vmem:[#allocation7] sm:$0xff] %v63_v16  ;;  %66 = vst [vmem:[#allocation8] sm:$0xff] %v65_v17 }
  0x48   :  { %168 = shalt.err (!%p165_p6)
}
  0x49   :  { %s169_s16 = scalar_lea.hbm %s285_s2, 128 }
  0x4a   :  { %p170_p7 = scmp.ne.s32.totalorder %s285_s2, %s169_s16  ;;  %p173_p8 = scmp.lt.u32.totalorder %s169_s16, %s285_s2 }
  0x4c   :  { %p175_p9 = pnand %p173_p8, %p170_p7 }
  0x4e   :  { %178 = shalt.err (!%p175_p9)
}
  0x4f   :  { %76 = dma.vmem_to_hbm [thread:$0]  %s74_s10, 128, %s285_s2, [#allocation4]  }
  0x50   :  { %s179_s23 = scalar_lea.vmem %s84_s12, 128  ;;  %p184_p11 = scmp.lt.s32.totalorder %s84_s12, %s84_s12 }
  0x51   :  { %p180_p10 = scmp.ne.s32.totalorder %s84_s12, %s179_s23  ;;  %p185_p12 = scmp.lt.s32.totalorder %s179_s23, %s179_s23 }
  0x53   :  { %p186_p13 = por %p185_p12, %p184_p11 }
  0x55   :  { %p187_p0 = pnand %p186_p13, %p180_p10 }
  0x57   :  { %190 = shalt.err (!%p187_p0)
}
  0x58   :  { %s191_s26 = scalar_lea.hbm %s286_s3, 128 }
  0x59   :  { %p192_p1 = scmp.ne.s32.totalorder %s286_s3, %s191_s26  ;;  %p195_p2 = scmp.lt.u32.totalorder %s191_s26, %s286_s3 }
  0x5b   :  { %p197_p3 = pnand %p195_p2, %p192_p1 }
  0x5d   :  { %200 = shalt.err (!%p197_p3)
}
  0x5e   :  { %86 = dma.vmem_to_hbm [thread:$0]  %s84_s12, 128, %s286_s3, [#allocation9]  }
  0x5f   :  { %205 = dma.done.wait [#allocation4], 128  }
  0x60   :  { %206 = vsyncadd [#allocation4], 4294967168 }
  0x61   :  { %207 = dma.done.wait [#allocation9], 128  }
  0x62   :  { %208 = vsyncadd [#allocation9], 4294967168 }
  0x63   :  { %93 = vsyncpa [#allocation3], 1 }
  0x64   :  { %94 = vsyncpa [#allocation6], 1 }
  0x65   :  { %95 = vsyncpa [#allocation4], 1 }
  0x66   :  { %96 = vsyncpa [#allocation9], 1 }

</bundles_post_ra>
